<compile_context>
chip_gen: v6e
topology: v6e:2x2x1
jax: 0.10.0
libtpu: 0.0.40
codegen_flags: <defaults>
</compile_context>

<pallas_src>
import functools

import jax
import jax.numpy as jnp
from jax.experimental import pallas as pl
from jax.experimental.pallas import tpu as pltpu

ALPHA = 0.25
GAMMA = 2          # forward() shadows __init__'s gamma=4 with a local gamma=2
EPS = 1e-7
LANES = 128
MAX_BLOCK_ROWS = 8192    # (8192,128) f32 = 4 MiB per input block
MIN_BLOCK_ROWS = 512     # don't split tiny inputs into many grid steps
TARGET_BLOCKS = 8        # aim for >= this many grid steps on large inputs
VMEM_LIMIT_BYTES = 32 * 1024 * 1024   # within physical VMEM on v5e/v6e/v7x


def _sublane_multiple(*dtypes):
    """Sublane tile multiple required by the narrowest streamed dtype."""
    m = 8
    for dt in dtypes:
        itemsize = max(1, jnp.dtype(dt).itemsize)
        m = max(m, 8 * max(1, 4 // itemsize))   # f32->8, bf16->16, int8->32
    return m


def _choose_block_rows(rows, max_block_rows, sub):
    """rows is a multiple of 8 and >= 8; returns a legal block row count."""
    mbr = max(sub, (max_block_rows // sub) * sub)
    target = max(-(-rows // TARGET_BLOCKS), MIN_BLOCK_ROWS)
    target = -(-target // sub) * sub
    br = min(mbr, target)
    if br >= rows:
        return rows          # single full-extent block (always a legal shape)
    return br                # multiple of `sub`; last block may be partial


def _focal_partial_kernel(pred_ref, tgt_ref, out_ref, *, block_rows,
                          valid_rows_last):
    # Upcast inside the kernel (inputs arrive in their native dtype).
    p = jnp.clip(pred_ref[...].astype(jnp.float32), EPS, 1.0 - EPS)
    t = tgt_ref[...].astype(jnp.float32)
    one_m_p = 1.0 - p

    # gamma == 2 -> explicit squares (VPU muls, not EUP pow).
    weight_a = ALPHA * (one_m_p * one_m_p) * t
    weight_b = (1.0 - ALPHA) * (p * p) * (1.0 - t)

    # Folded BCE core.  The exact PyTorch expression equals
    #   -(wa*log(p) + wb*log(1-p))
    # after the clamp; the leading negation is hoisted to the wrapper, so the
    # kernel accumulates the *negative* loss.
    neg_loss = weight_a * jnp.log(p) + weight_b * jnp.log(one_m_p)

    def write(vals):
        # (block_rows,128) -> (block_rows//8, 8, 128) regroups whole (8,128)
        # vreg tiles; the axis-0 sum is a chain of vreg-wise VPU adds — no XLU,
        # no carried state across grid steps.
        out_ref[0] = jnp.sum(vals.reshape(block_rows // 8, 8, LANES), axis=0)

    if valid_rows_last == block_rows:
        # block_rows divides the row count: every block is fully valid.
        write(neg_loss)
    else:
        # Only the last grid block is partial; rows >= valid_rows_last of that
        # block map outside the array and contain unspecified data — the
        # select discards them (safe even if they are NaN/Inf).
        is_last = pl.program_id(0) == pl.num_programs(0) - 1

        @pl.when(jnp.logical_not(is_last))
        def _():
            write(neg_loss)

        @pl.when(is_last)
        def _():
            row = jax.lax.broadcasted_iota(jnp.int32, (block_rows, LANES), 0)
            write(jnp.where(row < valid_rows_last, neg_loss, 0.0))


def _neg_loss_elems(p_raw, t):
    """Plain-JAX negative focal loss per element (used for the ragged tail)."""
    p = jnp.clip(p_raw.astype(jnp.float32), EPS, 1.0 - EPS)
    t = t.astype(jnp.float32)
    one_m_p = 1.0 - p
    wa = ALPHA * (one_m_p * one_m_p) * t
    wb = (1.0 - ALPHA) * (p * p) * (1.0 - t)
    return wa * jnp.log(p) + wb * jnp.log(one_m_p)


def focal_loss(pred, target, *, max_block_rows=MAX_BLOCK_ROWS):
    """Pallas implementation of FocalLoss().forward(pred, target) -> scalar."""
    n = pred.size
    pred_flat = pred.reshape(-1)        # native dtype, no cast / no pad
    tgt_flat = target.reshape(-1)
    if tgt_flat.dtype == jnp.bool_:
        tgt_flat = tgt_flat.astype(jnp.int8)   # bool refs are awkward in Mosaic

    rows_full = n // LANES
    rows_main = (rows_full // 8) * 8    # vreg-aligned prefix handled by kernel
    n_main = rows_main * LANES

    total = jnp.float32(0.0)

    if rows_main > 0:
        sub = _sublane_multiple(pred_flat.dtype, tgt_flat.dtype)
        block_rows = _choose_block_rows(rows_main, max_block_rows, sub)
        num_blocks = -(-rows_main // block_rows)
        valid_rows_last = rows_main - (num_blocks - 1) * block_rows

        pred2 = pred_flat[:n_main].reshape(rows_main, LANES)
        tgt2 = tgt_flat[:n_main].reshape(rows_main, LANES)

        kernel = functools.partial(_focal_partial_kernel,
                                   block_rows=block_rows,
                                   valid_rows_last=valid_rows_last)

        partials = pl.pallas_call(
            kernel,
            out_shape=jax.ShapeDtypeStruct((num_blocks, 8, LANES), jnp.float32),
            grid_spec=pltpu.PrefetchScalarGridSpec(
                num_scalar_prefetch=0,
                grid=(num_blocks,),
                in_specs=[
                    pl.BlockSpec((block_rows, LANES), lambda i: (i, 0)),
                    pl.BlockSpec((block_rows, LANES), lambda i: (i, 0)),
                ],
                out_specs=pl.BlockSpec((1, 8, LANES), lambda i: (i, 0, 0)),
            ),
            compiler_params=pltpu.CompilerParams(
                dimension_semantics=("parallel",),
                vmem_limit_bytes=VMEM_LIMIT_BYTES),
        )(pred2, tgt2)
        total = total + jnp.sum(partials)

    if n_main < n:
        # <1024-element ragged tail: fold into the sum in plain JAX.
        total = total + jnp.sum(
            _neg_loss_elems(pred_flat[n_main:], tgt_flat[n_main:]))

    # Kernel accumulated -loss; negate once here and take the mean.
    return -total / jnp.float32(n)


def _reference_focal_loss(pred, target):
    """Pure-JAX reference matching the PyTorch module expression exactly."""
    p = jnp.clip(pred.astype(jnp.float32), EPS, 1.0 - EPS)
    t = target.astype(jnp.float32)
    logits = jnp.log(p / (1.0 - p))
    wa = ALPHA * (1.0 - p) ** float(GAMMA) * t
    wb = (1.0 - ALPHA) * p ** float(GAMMA) * (1.0 - t)
    loss = (jnp.log1p(jnp.exp(-jnp.abs(logits))) + jnp.maximum(-logits, 0.0)) \
        * (wa + wb) + logits * wb
    return jnp.mean(loss)


if __name__ == "__main__":
    key = jax.random.PRNGKey(0)

    def make_inputs(k, shape):
        k1, k2 = jax.random.split(k)
        pred = jax.random.uniform(k1, shape, jnp.float32,
                                  minval=0.01, maxval=0.99)
        target = jax.random.bernoulli(k2, p=0.3, shape=shape).astype(jnp.float32)
        return pred, target

    # Case 1: NCHW shape, vreg-aligned -> single full-extent block, no mask.
    # Case 2: awkward shape -> exercises the plain-JAX ragged-tail path.
    for shape in [(2, 4, 16, 16), (3, 5, 7, 11)]:
        key, k = jax.random.split(key)
        pred, target = make_inputs(k, shape)
        out = jax.block_until_ready(focal_loss(pred, target))
        ref = _reference_focal_loss(pred, target)
        assert jnp.allclose(out, ref, rtol=1e-5, atol=1e-6), (shape, out, ref)

    # Case 3: force multiple grid blocks (parallel partial-sum path).
    key, k = jax.random.split(key)
    pred, target = make_inputs(k, (2, 4, 16, 16))
    out = jax.block_until_ready(focal_loss(pred, target, max_block_rows=8))
    ref = _reference_focal_loss(pred, target)
    assert jnp.allclose(out, ref, rtol=1e-5, atol=1e-6), (out, ref)

    # Case 4: partial last grid block -> exercises the in-kernel row mask.
    key, k = jax.random.split(key)
    pred, target = make_inputs(k, (2, 4, 20, 32))      # 5120 elems = 40 rows
    out = jax.block_until_ready(focal_loss(pred, target, max_block_rows=32))
    ref = _reference_focal_loss(pred, target)
    assert jnp.allclose(out, ref, rtol=1e-5, atol=1e-6), (out, ref)

    # Case 5: native narrow dtypes (bf16 pred, int8 target) DMA'd directly.
    key, k = jax.random.split(key)
    pred, target = make_inputs(k, (4, 4, 16, 16))
    pred_bf16 = pred.astype(jnp.bfloat16)
    target_i8 = target.astype(jnp.int8)
    out = jax.block_until_ready(focal_loss(pred_bf16, target_i8))
    ref = _reference_focal_loss(pred_bf16.astype(jnp.float32),
                                target_i8.astype(jnp.float32))
    assert jnp.allclose(out, ref, rtol=1e-5, atol=1e-6), (out, ref)

    print("KERNEL_OK")
</pallas_src>

<mosaic_0001>
module attributes {stable_mosaic.version = 11 : i64} {
  func.func @_focal_partial_kernel(%arg0: i32, %arg1: memref<16x128xf32, #tpu.memory_space<vmem>>, %arg2: memref<16x128xf32, #tpu.memory_space<vmem>>, %arg3: memref<1x8x128xf32, #tpu.memory_space<vmem>>) attributes {dimension_semantics = [#tpu.dimension_semantics<parallel>], iteration_bounds = array<i64: 1>, scalar_prefetch = 0 : i64, scratch_operands = 0 : i64, tpu.core_type = #tpu.core_type<tc>, window_params = [{transform_indices = @transform_0, window_bounds = array<i64: 16, 128>}, {transform_indices = @transform_1, window_bounds = array<i64: 16, 128>}, {transform_indices = @transform_2, window_bounds = array<i64: 1, 8, 128>}]} {
    %c0 = arith.constant 0 : index
    %c0_0 = arith.constant 0 : index
    %0 = vector.load %arg1[%c0, %c0_0] : memref<16x128xf32, #tpu.memory_space<vmem>>, vector<16x128xf32>
    %cst = arith.constant 1.000000e-07 : f32
    %cst_1 = arith.constant 0.99999988 : f32
    %1 = vector.broadcast %cst : f32 to vector<16x128xf32>
    %2 = arith.maximumf %1, %0 : vector<16x128xf32>
    %3 = vector.broadcast %cst_1 : f32 to vector<16x128xf32>
    %4 = arith.minimumf %3, %2 : vector<16x128xf32>
    %c0_2 = arith.constant 0 : index
    %c0_3 = arith.constant 0 : index
    %5 = vector.load %arg2[%c0_2, %c0_3] : memref<16x128xf32, #tpu.memory_space<vmem>>, vector<16x128xf32>
    %cst_4 = arith.constant 1.000000e+00 : f32
    %6 = vector.broadcast %cst_4 : f32 to vector<16x128xf32>
    %7 = arith.subf %6, %4 : vector<16x128xf32>
    %8 = arith.mulf %7, %7 : vector<16x128xf32>
    %cst_5 = arith.constant 2.500000e-01 : f32
    %9 = vector.broadcast %cst_5 : f32 to vector<16x128xf32>
    %10 = arith.mulf %9, %8 : vector<16x128xf32>
    %11 = arith.mulf %10, %5 : vector<16x128xf32>
    %12 = arith.mulf %4, %4 : vector<16x128xf32>
    %cst_6 = arith.constant 7.500000e-01 : f32
    %13 = vector.broadcast %cst_6 : f32 to vector<16x128xf32>
    %14 = arith.mulf %13, %12 : vector<16x128xf32>
    %cst_7 = arith.constant 1.000000e+00 : f32
    %15 = vector.broadcast %cst_7 : f32 to vector<16x128xf32>
    %16 = arith.subf %15, %5 : vector<16x128xf32>
    %17 = arith.mulf %14, %16 : vector<16x128xf32>
    %18 = math.log %4 : vector<16x128xf32>
    %19 = arith.mulf %11, %18 : vector<16x128xf32>
    %20 = math.log %7 : vector<16x128xf32>
    %21 = arith.mulf %17, %20 : vector<16x128xf32>
    %22 = arith.addf %19, %21 : vector<16x128xf32>
    %23 = vector.shape_cast %22 : vector<16x128xf32> to vector<2x8x128xf32>
    %cst_8 = arith.constant dense<0.000000e+00> : vector<8x128xf32>
    %24 = vector.multi_reduction <add>, %23, %cst_8 [0] : vector<2x8x128xf32> to vector<8x128xf32>
    %c0_9 = arith.constant 0 : index
    %c0_10 = arith.constant 0 : index
    %c0_11 = arith.constant 0 : index
    %25 = vector.load %arg3[%c0_9, %c0_10, %c0_11] : memref<1x8x128xf32, #tpu.memory_space<vmem>>, vector<1x8x128xf32>
    %26 = vector.shape_cast %25 : vector<1x8x128xf32> to vector<8x128xf32>
    %27 = vector.shape_cast %24 : vector<8x128xf32> to vector<1x8x128xf32>
    tpu.vector_store %arg3[%c0_9, %c0_10, %c0_11], %27 {strides = array<i32>} : memref<1x8x128xf32, #tpu.memory_space<vmem>>, vector<1x8x128xf32>,
    return
  }
  func.func @transform_0(%arg0: i32) -> (i32, i32) {
    %c0_i32 = arith.constant 0 : i32
    %c0_i32_0 = arith.constant 0 : i32
    return %arg0, %c0_i32 : i32, i32
  }
  func.func @transform_1(%arg0: i32) -> (i32, i32) {
    %c0_i32 = arith.constant 0 : i32
    %c0_i32_0 = arith.constant 0 : i32
    return %arg0, %c0_i32 : i32, i32
  }
  func.func @transform_2(%arg0: i32) -> (i32, i32, i32) {
    %c0_i32 = arith.constant 0 : i32
    %c0_i32_0 = arith.constant 0 : i32
    %c0_i32_1 = arith.constant 0 : i32
    return %arg0, %c0_i32, %c0_i32_0 : i32, i32, i32
  }
}

</mosaic_0001>

<bundles_post_ra>
// kernel: tpu_custom_call.1
= control target key start
LH: loop header
LB: loop body
LE: loop exit
PB: predicated region body
PF: predicated region fallthrough
CT: control target
= control target key end

     0   :  { %7 = vsyncpa [#allocation3], 0  ;;  %s204_s0 = inlined_call_operand.hbm [shape: f32[16,128], index: 0, kind: input, shape index: {}]   ;;  %s205_s1 = inlined_call_operand.hbm [shape: f32[16,128], index: 1, kind: input, shape index: {}]   ;;  %s206_s2 = inlined_call_operand.hbm [shape: f32[1,8,128], index: 2, kind: output, shape index: {}]  }
   0x1   :  { %8 = vsyncpa [#allocation6], 0 }
   0x2   :  { %9 = vsyncpa [#allocation4], 0  ;;  %s175_s9 = smov [#allocation2]  }
   0x3   :  { %s15_s10 = sshll.u32 %s175_s9, 4  ;;  %s16_s10 = int_to_ptr.vmem [resolvable:$true] %s15_s10 }
   0x4   :  { %s117_s11 = scalar_lea.vmem %s16_s10, 256  ;;  %p122_p1 = scmp.lt.s32.totalorder %s16_s10, %s16_s10 }
   0x5   :  { %p118_p0 = scmp.ne.s32.totalorder %s16_s10, %s117_s11  ;;  %p123_p2 = scmp.lt.s32.totalorder %s117_s11, %s117_s11 }
   0x7   :  { %p124_p3 = por %p123_p2, %p122_p1 }
   0x9   :  { %p125_p4 = pnand %p124_p3, %p118_p0 }
   0xb   :  { %128 = shalt.err (!%p125_p4)
}
   0xc   :  { %s176_s12 = smov 128   ;;  %s177_s13 = smov 8  }
   0xd   :  { %21 = dma.hbm_to_vmem [thread:$0]  %s204_s0, 256, %s16_s10, [#allocation3], %s176_s12, %s176_s12, %s177_s13  }
   0xe   :  { %s178_s16 = smov [#allocation5]  }
   0xf   :  { %s27_s17 = sshll.u32 %s178_s16, 4  ;;  %s28_s17 = int_to_ptr.vmem [resolvable:$true] %s27_s17 }
  0x10   :  { %s137_s18 = scalar_lea.vmem %s28_s17, 256  ;;  %p142_p6 = scmp.lt.s32.totalorder %s28_s17, %s28_s17 }
  0x11   :  { %p138_p5 = scmp.ne.s32.totalorder %s28_s17, %s137_s18  ;;  %p143_p7 = scmp.lt.s32.totalorder %s137_s18, %s137_s18 }
  0x13   :  { %p144_p8 = por %p143_p7, %p142_p6 }
  0x15   :  { %p145_p9 = pnand %p144_p8, %p138_p5 }
  0x17   :  { %148 = shalt.err (!%p145_p9)
}
  0x18   :  { %33 = dma.hbm_to_vmem [thread:$0]  %s205_s1, 256, %s28_s17, [#allocation6], %s176_s12, %s176_s12, %s177_s13  }
  0x19   :  { %169 = dma.done.wait [#allocation3], 256  }
  0x1a   :  { %170 = vsyncadd [#allocation3], 4294967040 }
  0x1b   :  { %171 = dma.done.wait [#allocation6], 256  }
  0x1c   :  { %172 = vsyncadd [#allocation6], 4294967040  ;;  %v40_v0 = vld [vmem:[#allocation2] sm:$0xff]  ;;  %v41_v1 = vld [vmem:[#allocation2 + $0x8] sm:$0xff]  ;;  %s179_s0 = smov [#allocation7]  }
  0x1d   :  { %v42_v2 = vmax.f32 %v40_v0, 1e-07  ;;  %v43_v3 = vmax.f32 %v41_v1, 1e-07  ;;  %v46_v11 = vld [vmem:[#allocation5] sm:$0xff]  ;;  %v47_v13 = vld [vmem:[#allocation5 + $0x8] sm:$0xff] }
  0x1e   :  { %v60_v17 = vsub.f32 1.0, %v46_v11  ;;  %v61_v20 = vsub.f32 1.0, %v47_v13  ;;  %s86_s1 = sshll.u32 %s179_s0, 4  ;;  %s87_s1 = int_to_ptr.vmem [resolvable:$true] %s86_s1 }
  0x1f   :  { %v44_v4 = vmin.f32 %v42_v2, 0.9999999  ;;  %v45_v5 = vmin.f32 %v43_v3, 0.9999999  ;;  %s149_s21 = scalar_lea.vmem %s87_s1, 128  ;;  %p154_p11 = scmp.lt.s32.totalorder %s87_s1, %s87_s1 }
  0x20   :  { %p150_p10 = scmp.ne.s32.totalorder %s87_s1, %s149_s21  ;;  %p155_p12 = scmp.lt.s32.totalorder %s149_s21, %s149_s21 }
  0x21   :  { %v48_v6 = vsub.f32 1.0, %v44_v4  ;;  %101 = vlog2.f32 %v44_v4  ;;  %v49_v7 = vsub.f32 1.0, %v45_v5  ;;  %v56_v10 = vmul.f32 %v44_v4, %v44_v4 }
  0x22   :  { %103 = vlog2.f32 %v45_v5  ;;  %v57_v12 = vmul.f32 %v45_v5, %v45_v5  ;;  %p156_p13 = por %p155_p12, %p154_p11 }
  0x23   :  { %105 = vlog2.f32 %v48_v6  ;;  %v50_v8 = vmul.f32 %v48_v6, %v48_v6  ;;  %v51_v9 = vmul.f32 %v49_v7, %v49_v7  ;;  %v58_v16 = vmul.f32 0.75, %v56_v10 }
  0x24   :  { %107 = vlog2.f32 %v49_v7  ;;  %v59_v19 = vmul.f32 0.75, %v57_v12  ;;  %p157_p0 = pnand %p156_p13, %p150_p10 }
  0x25   :  { %v52_v14 = vmul.f32 0.25, %v50_v8  ;;  %v53_v15 = vmul.f32 0.25, %v51_v9  ;;  %v62_v25 = vmul.f32 %v60_v17, %v58_v16 }
  0x26   :  { %v63_v28 = vmul.f32 %v61_v20, %v59_v19 }
  0x27   :  { %v54_v21 = vmul.f32 %v52_v14, %v46_v11  ;;  %v55_v24 = vmul.f32 %v53_v15, %v47_v13 }
  0x2e   :  { %v102_v18 = vpop.eup %101 }
  0x2f   :  { %v65_v22 = vmul.f32 0.6931472, %v102_v18  ;;  %v104_v23 = vpop.eup %103 }
  0x30   :  { %v67_v26 = vmul.f32 0.6931472, %v104_v23  ;;  %v106_v27 = vpop.eup %105 }
  0x31   :  { %v108_v29 = vpop.eup %107  ;;  %v68_v30 = vmul.f32 %v65_v22, %v54_v21  ;;  %v71_v31 = vmul.f32 0.6931472, %v106_v27 }
  0x32   :  { %v69_v32 = vmul.f32 %v67_v26, %v55_v24  ;;  %v73_v33 = vmul.f32 0.6931472, %v108_v29 }
  0x33   :  { %v74_v34 = vmul.f32 %v71_v31, %v62_v25 }
  0x34   :  { %v75_v35 = vmul.f32 %v73_v33, %v63_v28 }
  0x35   :  { %v76_v36 = vadd.f32 %v74_v34, %v68_v30 }
  0x36   :  { %v77_v37 = vadd.f32 %v75_v35, %v69_v32 }
  0x38   :  { %v78_v38 = vadd.f32 %v77_v37, %v76_v36 }
  0x3a   :  { %79 = vst [vmem:[#allocation7] sm:$0xff] %v78_v38 }
  0x3b   :  { %160 = shalt.err (!%p157_p0)
}
  0x3c   :  { %89 = dma.vmem_to_hbm [thread:$0]  %s87_s1, 128, %s206_s2, [#allocation4]  }
  0x3d   :  { %173 = dma.done.wait [#allocation4], 128  }
  0x3e   :  { %174 = vsyncadd [#allocation4], 4294967168 }
  0x3f   :  { %93 = vsyncpa [#allocation3], 1 }
  0x40   :  { %94 = vsyncpa [#allocation6], 1 }
  0x41   :  { %95 = vsyncpa [#allocation4], 1 }

</bundles_post_ra>
